<compile_context>
chip_gen: v7x
topology: tpu7x:2x2x1
jax: 0.10.0
libtpu: 0.0.40
codegen_flags: <defaults>
</compile_context>

<pallas_src>
import jax
import jax.numpy as jnp
from jax.experimental import pallas as pl
from jax.experimental.pallas import tpu as pltpu


def _clone_head_kernel(x_ref, wt_ref, b_ref, scores_ref):
    """scores = sum(linear(x1) * linear(x2), axis=1) / 10, with x = [x1; x2].

    x_ref      : (2B, H) bf16  — rows [0, B) are cls1, rows [B, 2B) are cls2
    wt_ref     : (H, H)  bf16  — linear weight, already transposed (W.T)
    b_ref      : (1, H)  f32   — linear bias
    scores_ref : (B, 1)  f32   — output scores
    """
    B = scores_ref.shape[0]

    # Single fused Linear(768, 768) over both stacked inputs:
    #   y = [x1; x2] @ W.T + b   (MXU bf16 matmul, f32 accumulation)
    y = jnp.dot(x_ref[...], wt_ref[...],
                preferred_element_type=jnp.float32) + b_ref[...]

    # Split back into the two projections (static, sublane-tile-aligned slices
    # since B is a multiple of 8 here).
    y1 = y[:B, :]
    y2 = y[B:, :]

    # scores = sum(out1 * out2, dim=1) / 10
    scores = jnp.sum(y1 * y2, axis=1, keepdims=True) * 0.1
    scores_ref[...] = scores.astype(scores_ref.dtype)


@jax.jit
def clone_detector_head(cls1, cls2, weight, bias):
    """Pallas wrapper for the CloneDetector forward head.

    cls1, cls2 : [B, H] float32 CLS-token embeddings (stand-in for
                 model(**code).last_hidden_state[:, 0, :])
    weight     : [H, H] nn.Linear weight (PyTorch convention: y = x @ W.T + b)
    bias       : [H]    nn.Linear bias
    returns    : [B]    float32 scores
    """
    B, H = cls1.shape

    # Glue (outside the kernel): stack the two CLS batches so the kernel does a
    # single matmul, pre-transpose the weight, and cast the HBM-dominant
    # operands to bf16.  Bias stays f32 and is added after the f32-accumulated
    # matmul.
    x = jnp.concatenate([cls1, cls2], axis=0).astype(jnp.bfloat16)   # (2B, H)
    wt = jnp.transpose(weight).astype(jnp.bfloat16)                  # (H, H)
    b2 = bias.reshape(1, H).astype(jnp.float32)                      # (1, H)

    # No grid: operands live whole and single-buffered in VMEM (everything fits
    # easily at H=768), so there is no useless double-buffering of the weight.
    scores = pl.pallas_call(
        _clone_head_kernel,
        out_shape=jax.ShapeDtypeStruct((B, 1), jnp.float32),
        in_specs=[
            pl.BlockSpec(memory_space=pltpu.MemorySpace.VMEM),
            pl.BlockSpec(memory_space=pltpu.MemorySpace.VMEM),
            pl.BlockSpec(memory_space=pltpu.MemorySpace.VMEM),
        ],
        out_specs=pl.BlockSpec(memory_space=pltpu.MemorySpace.VMEM),
    )(x, wt, b2)
    return scores[:, 0]


def _reference(cls1, cls2, weight, bias):
    y1 = cls1 @ weight.T + bias
    y2 = cls2 @ weight.T + bias
    return jnp.sum(y1 * y2, axis=1) / 10.0


if __name__ == "__main__":
    # TODO(synk): the pretrained CodeBERT encoder (AutoModel.from_pretrained)
    # is not reproducible in-script; CLS embeddings are synthesized instead.
    B, H = 8, 768  # hidden=768 as implied by Linear(768, 768)

    key = jax.random.PRNGKey(0)
    k1, k2, kw, kb = jax.random.split(key, 4)

    cls1 = jax.random.normal(k1, (B, H), dtype=jnp.float32)
    cls2 = jax.random.normal(k2, (B, H), dtype=jnp.float32)
    # Deterministic Linear(768, 768) params (uniform init, like PyTorch's default scale)
    bound = 1.0 / (H ** 0.5)
    weight = jax.random.uniform(kw, (H, H), minval=-bound, maxval=bound, dtype=jnp.float32)
    bias = jax.random.uniform(kb, (H,), minval=-bound, maxval=bound, dtype=jnp.float32)

    scores = clone_detector_head(cls1, cls2, weight, bias)
    scores = jax.block_until_ready(scores)

    ref = _reference(cls1, cls2, weight, bias)
    assert scores.shape == (B,)
    # Tolerance relaxed for the bf16 operand path (f32 accumulation keeps the
    # error ~1e-2 absolute on O(1) scores).
    assert jnp.allclose(scores, ref, rtol=2e-2, atol=2e-2), (scores, ref)

    print("KERNEL_OK")
</pallas_src>

<mosaic_0001>
module attributes {stable_mosaic.version = 11 : i64} {
  func.func @_clone_head_kernel(%arg0: memref<16x768xbf16, #tpu.memory_space<vmem>>, %arg1: memref<768x768xbf16, #tpu.memory_space<vmem>>, %arg2: memref<1x768xf32, #tpu.memory_space<vmem>>, %arg3: memref<8x1xf32, #tpu.memory_space<vmem>>) attributes {dimension_semantics = [], scalar_prefetch = 0 : i64, scratch_operands = 0 : i64, tpu.core_type = #tpu.core_type<tc>} {
    %c0 = arith.constant 0 : index
    %c0_0 = arith.constant 0 : index
    %0 = vector.load %arg0[%c0, %c0_0] : memref<16x768xbf16, #tpu.memory_space<vmem>>, vector<16x768xbf16>
    %c0_1 = arith.constant 0 : index
    %c0_2 = arith.constant 0 : index
    %1 = vector.load %arg1[%c0_1, %c0_2] : memref<768x768xbf16, #tpu.memory_space<vmem>>, vector<768x768xbf16>
    %cst = arith.constant dense<0.000000e+00> : vector<16x768xf32>
    %2 = tpu.matmul %0, %1, %cst {dimension_numbers = #tpu.dot_dimension_numbers<[1], [0], [0], [1], [0, 0, 1, 1], [], []>} : vector<16x768xbf16>, vector<768x768xbf16>, vector<16x768xf32> -> vector<16x768xf32>
    %c0_3 = arith.constant 0 : index
    %c0_4 = arith.constant 0 : index
    %3 = vector.load %arg2[%c0_3, %c0_4] : memref<1x768xf32, #tpu.memory_space<vmem>>, vector<1x768xf32>
    %4 = vector.broadcast %3 : vector<1x768xf32> to vector<16x768xf32>
    %5 = arith.addf %2, %4 : vector<16x768xf32>
    %6 = vector.extract_strided_slice %5 {offsets = [0, 0], sizes = [8, 768], strides = [1, 1]} : vector<16x768xf32> to vector<8x768xf32>
    %7 = vector.extract_strided_slice %5 {offsets = [8, 0], sizes = [8, 768], strides = [1, 1]} : vector<16x768xf32> to vector<8x768xf32>
    %8 = arith.mulf %6, %7 : vector<8x768xf32>
    %cst_5 = arith.constant dense<0.000000e+00> : vector<8xf32>
    %9 = vector.multi_reduction <add>, %8, %cst_5 [1] : vector<8x768xf32> to vector<8xf32>
    %10 = vector.shape_cast %9 : vector<8xf32> to vector<8x1xf32>
    %cst_6 = arith.constant 1.000000e-01 : f32
    %11 = vector.broadcast %cst_6 : f32 to vector<8x1xf32>
    %12 = arith.mulf %10, %11 : vector<8x1xf32>
    %c0_7 = arith.constant 0 : index
    %c0_8 = arith.constant 0 : index
    %13 = vector.load %arg3[%c0_7, %c0_8] : memref<8x1xf32, #tpu.memory_space<vmem>>, vector<8x1xf32>
    tpu.vector_store %arg3[%c0_7, %c0_8], %12 {strides = array<i32>} : memref<8x1xf32, #tpu.memory_space<vmem>>, vector<8x1xf32>,
    return
  }
}

</mosaic_0001>

<bundles_post_ra>
// kernel: clone_detector_head.1
= control target key start
LH: loop header
LB: loop body
LE: loop exit
PB: predicated region body
PF: predicated region fallthrough
CT: control target
= control target key end

     0   :  { %vm2211_vm0 = vcmask 7168   ;;  %s3932_s1 = inlined_call_operand.vmem [shape: bf16[768,768], index: 1, kind: input, shape index: {}]   ;;  %s3933_s0 = inlined_call_operand.vmem [shape: bf16[16,768], index: 0, kind: input, shape index: {}]   ;;  %s3934_s2 = inlined_call_operand.vmem [shape: f32[1,768], index: 2, kind: input, shape index: {}]   ;;  %s3935_s3 = inlined_call_operand.vmem [shape: f32[8,1], index: 3, kind: output, shape index: {}]  }
   0x1   :  { %v2547_v0 = vld [vmem:[%s3932_s1 + $0x4] ss:$24 sps:$4 sm:$0xff]   ;;  %v2551_v2 = vld [vmem:[%s3932_s1] ss:$24 sps:$4 sm:$0xff]   ;;  %v2553_v4 = vld [vmem:[%s3932_s1 + $0x34] ss:$24 sps:$4 sm:$0xff]  }
   0x2   :  { %v2549_v1 = vld [vmem:[%s3932_s1 + $0x304] ss:$24 sps:$4 sm:$0xff]   ;;  %1810 = vmatprep.subr.bf16.mxu1 %v2547_v0  ;;  %v2552_v3 = vld [vmem:[%s3932_s1 + $0x300] ss:$24 sps:$4 sm:$0xff]   ;;  %v2555_v5 = vld [vmem:[%s3932_s1 + $0x334] ss:$24 sps:$4 sm:$0xff]  }
   0x3   :  { %1853 = vmatprep.subr.bf16.mxu0 %v2549_v1  ;;  %1811 = vmatpush1.bf16.msra.mxu1 %v2551_v2  ;;  %v2557_v6 = vld [vmem:[%s3932_s1 + $0x30] ss:$24 sps:$4 sm:$0xff]   ;;  %v2559_v8 = vld [vmem:[%s3932_s1 + $0x64] ss:$24 sps:$4 sm:$0xff]   ;;  %v2563_v10 = vld [vmem:[%s3932_s1 + $0x60] ss:$24 sps:$4 sm:$0xff]  }
   0x4   :  { %1854 = vmatpush1.bf16.msra.mxu0 %v2552_v3  ;;  %1812 = vmatprep.subr.bf16.mxu1 %v2553_v4  ;;  %v2558_v7 = vld [vmem:[%s3932_s1 + $0x330] ss:$24 sps:$4 sm:$0xff]   ;;  %v2561_v9 = vld [vmem:[%s3932_s1 + $0x364] ss:$24 sps:$4 sm:$0xff]   ;;  %v2564_v11 = vld [vmem:[%s3932_s1 + $0x360] ss:$24 sps:$4 sm:$0xff]  }
   0x5   :  { %1855 = vmatprep.subr.bf16.mxu0 %v2555_v5  ;;  %v2565_v12 = vld [vmem:[%s3932_s1 + $0x94] ss:$24 sps:$4 sm:$0xff]   ;;  %v2569_v14 = vld [vmem:[%s3932_s1 + $0x90] ss:$24 sps:$4 sm:$0xff]   ;;  %v2571_v16 = vld [vmem:[%s3932_s1 + $0xc4] ss:$24 sps:$4 sm:$0xff]  }
   0x6   :  { %v2567_v13 = vld [vmem:[%s3932_s1 + $0x394] ss:$24 sps:$4 sm:$0xff]   ;;  %v2570_v15 = vld [vmem:[%s3932_s1 + $0x390] ss:$24 sps:$4 sm:$0xff]   ;;  %v2573_v17 = vld [vmem:[%s3932_s1 + $0x3c4] ss:$24 sps:$4 sm:$0xff]  }
   0x7   :  { %1813 = vmatpush1.bf16.msra.mxu1 %v2557_v6  ;;  %v2575_v18 = vld [vmem:[%s3932_s1 + $0xc0] ss:$24 sps:$4 sm:$0xff]   ;;  %v2577_v20 = vld [vmem:[%s3932_s1 + $0xf4] ss:$24 sps:$4 sm:$0xff]   ;;  %v2581_v22 = vld [vmem:[%s3932_s1 + $0xf0] ss:$24 sps:$4 sm:$0xff]  }
   0x8   :  { %1856 = vmatpush1.bf16.msra.mxu0 %v2558_v7  ;;  %1814 = vmatprep.subr.bf16.mxu1 %v2559_v8  ;;  %v2576_v19 = vld [vmem:[%s3932_s1 + $0x3c0] ss:$24 sps:$4 sm:$0xff]   ;;  %v2579_v21 = vld [vmem:[%s3932_s1 + $0x3f4] ss:$24 sps:$4 sm:$0xff]   ;;  %v2582_v23 = vld [vmem:[%s3932_s1 + $0x3f0] ss:$24 sps:$4 sm:$0xff]  }
   0x9   :  { %1857 = vmatprep.subr.bf16.mxu0 %v2561_v9  ;;  %v2583_v24 = vld [vmem:[%s3932_s1 + $0x124] ss:$24 sps:$4 sm:$0xff]   ;;  %v2587_v26 = vld [vmem:[%s3932_s1 + $0x120] ss:$24 sps:$4 sm:$0xff]   ;;  %v2589_v28 = vld [vmem:[%s3932_s1 + $0x154] ss:$24 sps:$4 sm:$0xff]  }
   0xa   :  { %v2585_v25 = vld [vmem:[%s3932_s1 + $0x424] ss:$24 sps:$4 sm:$0xff]   ;;  %v2588_v27 = vld [vmem:[%s3932_s1 + $0x420] ss:$24 sps:$4 sm:$0xff]   ;;  %v2591_v29 = vld [vmem:[%s3932_s1 + $0x454] ss:$24 sps:$4 sm:$0xff]  }
   0xb   :  { %1815 = vmatpush1.bf16.msra.mxu1 %v2563_v10  ;;  %v2593_v30 = vld [vmem:[%s3932_s1 + $0x150] ss:$24 sps:$4 sm:$0xff]   ;;  %v2595_v32 = vld [vmem:[%s3932_s1 + $0x184] ss:$24 sps:$4 sm:$0xff]   ;;  %v2599_v34 = vld [vmem:[%s3932_s1 + $0x180] ss:$24 sps:$4 sm:$0xff]  }
   0xc   :  { %1858 = vmatpush1.bf16.msra.mxu0 %v2564_v11  ;;  %1816 = vmatprep.subr.bf16.mxu1 %v2565_v12  ;;  %v2594_v31 = vld [vmem:[%s3932_s1 + $0x450] ss:$24 sps:$4 sm:$0xff]   ;;  %v2597_v33 = vld [vmem:[%s3932_s1 + $0x484] ss:$24 sps:$4 sm:$0xff]   ;;  %v2600_v35 = vld [vmem:[%s3932_s1 + $0x480] ss:$24 sps:$4 sm:$0xff]  }
   0xd   :  { %1859 = vmatprep.subr.bf16.mxu0 %v2567_v13  ;;  %v2601_v36 = vld [vmem:[%s3932_s1 + $0x1b4] ss:$24 sps:$4 sm:$0xff]   ;;  %v2605_v38 = vld [vmem:[%s3932_s1 + $0x1b0] ss:$24 sps:$4 sm:$0xff]   ;;  %v2607_v40 = vld [vmem:[%s3932_s1 + $0x1e4] ss:$24 sps:$4 sm:$0xff]  }
   0xe   :  { %v2603_v37 = vld [vmem:[%s3932_s1 + $0x4b4] ss:$24 sps:$4 sm:$0xff]   ;;  %v2606_v39 = vld [vmem:[%s3932_s1 + $0x4b0] ss:$24 sps:$4 sm:$0xff]   ;;  %v2609_v41 = vld [vmem:[%s3932_s1 + $0x4e4] ss:$24 sps:$4 sm:$0xff]  }
   0xf   :  { %1817 = vmatpush1.bf16.msra.mxu1 %v2569_v14  ;;  %v2611_v42 = vld [vmem:[%s3932_s1 + $0x1e0] ss:$24 sps:$4 sm:$0xff]   ;;  %v2613_v44 = vld [vmem:[%s3932_s1 + $0x214] ss:$24 sps:$4 sm:$0xff]   ;;  %v2617_v46 = vld [vmem:[%s3932_s1 + $0x210] ss:$24 sps:$4 sm:$0xff]  }
  0x10   :  { %1860 = vmatpush1.bf16.msra.mxu0 %v2570_v15  ;;  %1818 = vmatprep.subr.bf16.mxu1 %v2571_v16  ;;  %v2612_v43 = vld [vmem:[%s3932_s1 + $0x4e0] ss:$24 sps:$4 sm:$0xff]   ;;  %v2615_v45 = vld [vmem:[%s3932_s1 + $0x514] ss:$24 sps:$4 sm:$0xff]   ;;  %v2618_v47 = vld [vmem:[%s3932_s1 + $0x510] ss:$24 sps:$4 sm:$0xff]  }
  0x11   :  { %1861 = vmatprep.subr.bf16.mxu0 %v2573_v17  ;;  %v3157_v48 = vld [vmem:[%s3933_s0 + $0x4] ss:$24 sps:$4 sm:$0xff]   ;;  %v2623_v52 = vld [vmem:[%s3932_s1 + $0x240] ss:$24 sps:$4 sm:$0xff]   ;;  %v2625_v54 = vld [vmem:[%s3932_s1 + $0x274] ss:$24 sps:$4 sm:$0xff]  }
  0x12   :  { %v3162_v49 = vld [vmem:[%s3933_s0 + $0xc] ss:$24 sps:$4 sm:$0xff]   ;;  %1842 = vmatprep.mubr.bf16.mxu1 %v3157_v48  ;;  %v2624_v53 = vld [vmem:[%s3932_s1 + $0x540] ss:$24 sps:$4 sm:$0xff]   ;;  %v2629_v56 = vld [vmem:[%s3932_s1 + $0x270] ss:$24 sps:$4 sm:$0xff]  }
  0x13   :  { %1819 = vmatpush1.bf16.msra.mxu1 %v2575_v18  ;;  %v2619_v50 = vld [vmem:[%s3932_s1 + $0x244] ss:$24 sps:$4 sm:$0xff]   ;;  %1885 = vmatprep.mubr.bf16.mxu0 %v3162_v49  ;;  %v2627_v55 = vld [vmem:[%s3932_s1 + $0x574] ss:$24 sps:$4 sm:$0xff]   ;;  %v2630_v57 = vld [vmem:[%s3932_s1 + $0x570] ss:$24 sps:$4 sm:$0xff]  }
  0x14   :  { %1862 = vmatpush1.bf16.msra.mxu0 %v2576_v19  ;;  %1820 = vmatprep.subr.bf16.mxu1 %v2577_v20  ;;  %v2621_v51 = vld [vmem:[%s3932_s1 + $0x544] ss:$24 sps:$4 sm:$0xff]   ;;  %v2635_v60 = vld [vmem:[%s3932_s1 + $0x2a0] ss:$24 sps:$4 sm:$0xff]   ;;  %v2637_v62 = vld [vmem:[%s3932_s1 + $0x2d4] ss:$24 sps:$4 sm:$0xff]  }
  0x15   :  { %1863 = vmatprep.subr.bf16.mxu0 %v2579_v21  ;;  %v2631_v58 = vld [vmem:[%s3932_s1 + $0x2a4] ss:$24 sps:$4 sm:$0xff]   ;;  %v2636_v61 = vld [vmem:[%s3932_s1 + $0x5a0] ss:$24 sps:$4 sm:$0xff]   ;;  %v2639_v63 = vld [vmem:[%s3932_s1 + $0x5d4] ss:$24 sps:$4 sm:$0xff]  }
  0x16   :  { %v2633_v59 = vld [vmem:[%s3932_s1 + $0x5a4] ss:$24 sps:$4 sm:$0xff]   ;;  %v2641_v0 = vld [vmem:[%s3932_s1 + $0x2d0] ss:$24 sps:$4 sm:$0xff]   ;;  %v2647_v4 = vld [vmem:[%s3932_s1 + $0x600] ss:$24 sps:$4 sm:$0xff]  }
  0x17   :  { %1821 = vmatpush1.bf16.msra.mxu1 %v2581_v22  ;;  %v2642_v1 = vld [vmem:[%s3932_s1 + $0x5d0] ss:$24 sps:$4 sm:$0xff]   ;;  %v2649_v2 = vld [vmem:[%s3932_s1 + $0x604] ss:$24 sps:$4 sm:$0xff]   ;;  %v3229_v6 = vld [vmem:[%s3933_s0] ss:$24 sps:$4 sm:$0xff]  }
  0x18   :  { %1864 = vmatpush1.bf16.msra.mxu0 %v2582_v23  ;;  %1822 = vmatprep.subr.bf16.mxu1 %v2583_v24  ;;  %v2652_v3 = vld [vmem:[%s3932_s1 + $0xc] ss:$24 sps:$4 sm:$0xff]   ;;  %v2650_v5 = vld [vmem:[%s3932_s1 + $0x8] ss:$24 sps:$4 sm:$0xff]   ;;  %v2660_v9 = vld [vmem:[%s3932_s1 + $0x3c] ss:$24 sps:$4 sm:$0xff]  }
  0x19   :  { %1865 = vmatprep.subr.bf16.mxu0 %v2585_v25  ;;  %v3234_v7 = vld [vmem:[%s3933_s0 + $0x8] ss:$24 sps:$4 sm:$0xff]   ;;  %v2657_v8 = vld [vmem:[%s3932_s1 + $0x634] ss:$24 sps:$4 sm:$0xff]   ;;  %v2658_v11 = vld [vmem:[%s3932_s1 + $0x38] ss:$24 sps:$4 sm:$0xff]  }
  0x1a   :  { %v2655_v10 = vld [vmem:[%s3932_s1 + $0x630] ss:$24 sps:$4 sm:$0xff]   ;;  %v2663_v12 = vld [vmem:[%s3932_s1 + $0x664] ss:$24 sps:$4 sm:$0xff]   ;;  %v2661_v14 = vld [vmem:[%s3932_s1 + $0x660] ss:$24 sps:$4 sm:$0xff]  }
  0x1b   :  { %1823 = vmatpush1.bf16.msra.mxu1 %v2587_v26  ;;  %v2666_v13 = vld [vmem:[%s3932_s1 + $0x6c] ss:$24 sps:$4 sm:$0xff]   ;;  %v2664_v15 = vld [vmem:[%s3932_s1 + $0x68] ss:$24 sps:$4 sm:$0xff]   ;;  %v2672_v17 = vld [vmem:[%s3932_s1 + $0x9c] ss:$24 sps:$4 sm:$0xff]  }
  0x1c   :  { %1866 = vmatpush1.bf16.msra.mxu0 %v2588_v27  ;;  %1824 = vmatprep.subr.bf16.mxu1 %v2589_v28  ;;  %v2669_v16 = vld [vmem:[%s3932_s1 + $0x694] ss:$24 sps:$4 sm:$0xff]   ;;  %v2667_v18 = vld [vmem:[%s3932_s1 + $0x690] ss:$24 sps:$4 sm:$0xff]   ;;  %v2675_v20 = vld [vmem:[%s3932_s1 + $0x6c4] ss:$24 sps:$4 sm:$0xff]  }
  0x1d   :  { %1867 = vmatprep.subr.bf16.mxu0 %v2591_v29  ;;  %v2670_v19 = vld [vmem:[%s3932_s1 + $0x98] ss:$24 sps:$4 sm:$0xff]   ;;  %v2678_v21 = vld [vmem:[%s3932_s1 + $0xcc] ss:$24 sps:$4 sm:$0xff]   ;;  %v2676_v23 = vld [vmem:[%s3932_s1 + $0xc8] ss:$24 sps:$4 sm:$0xff]  }
  0x1e   :  { %v2673_v22 = vld [vmem:[%s3932_s1 + $0x6c0] ss:$24 sps:$4 sm:$0xff]   ;;  %v2681_v24 = vld [vmem:[%s3932_s1 + $0x6f4] ss:$24 sps:$4 sm:$0xff]   ;;  %v2679_v26 = vld [vmem:[%s3932_s1 + $0x6f0] ss:$24 sps:$4 sm:$0xff]  }
  0x1f   :  { %1825 = vmatpush1.bf16.msra.mxu1 %v2593_v30  ;;  %v2684_v25 = vld [vmem:[%s3932_s1 + $0xfc] ss:$24 sps:$4 sm:$0xff]   ;;  %v2682_v27 = vld [vmem:[%s3932_s1 + $0xf8] ss:$24 sps:$4 sm:$0xff]   ;;  %v2690_v29 = vld [vmem:[%s3932_s1 + $0x12c] ss:$24 sps:$4 sm:$0xff]  }
  0x20   :  { %1868 = vmatpush1.bf16.msra.mxu0 %v2594_v31  ;;  %1826 = vmatprep.subr.bf16.mxu1 %v2595_v32  ;;  %v2687_v28 = vld [vmem:[%s3932_s1 + $0x724] ss:$24 sps:$4 sm:$0xff]   ;;  %v2685_v30 = vld [vmem:[%s3932_s1 + $0x720] ss:$24 sps:$4 sm:$0xff]   ;;  %v2693_v32 = vld [vmem:[%s3932_s1 + $0x754] ss:$24 sps:$4 sm:$0xff]  }
  0x21   :  { %1869 = vmatprep.subr.bf16.mxu0 %v2597_v33  ;;  %v2688_v31 = vld [vmem:[%s3932_s1 + $0x128] ss:$24 sps:$4 sm:$0xff]   ;;  %v2696_v33 = vld [vmem:[%s3932_s1 + $0x15c] ss:$24 sps:$4 sm:$0xff]  }
  0x23   :  { %1827 = vmatpush1.bf16.msra.mxu1 %v2599_v34  ;;  %v3320_v34 = vld [vmem:[%s3933_s0 + $0x14] ss:$24 sps:$4 sm:$0xff]  }
  0x24   :  { %1870 = vmatpush1.bf16.msra.mxu0 %v2600_v35  ;;  %1828 = vmatprep.subr.bf16.mxu1 %v2601_v36  ;;  %v2691_v35 = vld [vmem:[%s3932_s1 + $0x750] ss:$24 sps:$4 sm:$0xff]  }
  0x25   :  { %1871 = vmatprep.subr.bf16.mxu0 %v2603_v37  ;;  %v2694_v36 = vld [vmem:[%s3932_s1 + $0x158] ss:$24 sps:$4 sm:$0xff]   ;;  %v2699_v37 = vld [vmem:[%s3932_s1 + $0x784] ss:$24 sps:$4 sm:$0xff]  }
  0x27   :  { %1829 = vmatpush1.bf16.msra.mxu1 %v2605_v38  ;;  %v2702_v38 = vld [vmem:[%s3932_s1 + $0x18c] ss:$24 sps:$4 sm:$0xff]  }
  0x28   :  { %1872 = vmatpush1.bf16.msra.mxu0 %v2606_v39  ;;  %1830 = vmatprep.subr.bf16.mxu1 %v2607_v40  ;;  %v2697_v39 = vld [vmem:[%s3932_s1 + $0x780] ss:$24 sps:$4 sm:$0xff]  }
  0x29   :  { %1873 = vmatprep.subr.bf16.mxu0 %v2609_v41  ;;  %v2700_v40 = vld [vmem:[%s3932_s1 + $0x188] ss:$24 sps:$4 sm:$0xff]   ;;  %v2705_v41 = vld [vmem:[%s3932_s1 + $0x7b4] ss:$24 sps:$4 sm:$0xff]  }
  0x2b   :  { %1831 = vmatpush1.bf16.msra.mxu1 %v2611_v42  ;;  %v2708_v42 = vld [vmem:[%s3932_s1 + $0x1bc] ss:$24 sps:$4 sm:$0xff]  }
  0x2c   :  { %1874 = vmatpush1.bf16.msra.mxu0 %v2612_v43  ;;  %1832 = vmatprep.subr.bf16.mxu1 %v2613_v44  ;;  %v2703_v43 = vld [vmem:[%s3932_s1 + $0x7b0] ss:$24 sps:$4 sm:$0xff]  }
  0x2d   :  { %1875 = vmatprep.subr.bf16.mxu0 %v2615_v45  ;;  %v2706_v44 = vld [vmem:[%s3932_s1 + $0x1b8] ss:$24 sps:$4 sm:$0xff]   ;;  %v2711_v45 = vld [vmem:[%s3932_s1 + $0x7e4] ss:$24 sps:$4 sm:$0xff]  }
  0x2f   :  { %1833 = vmatpush1.bf16.msra.mxu1 %v2617_v46  ;;  %v2714_v46 = vld [vmem:[%s3932_s1 + $0x1ec] ss:$24 sps:$4 sm:$0xff]  }
  0x30   :  { %1876 = vmatpush1.bf16.msra.mxu0 %v2618_v47  ;;  %1834 = vmatprep.subr.bf16.mxu1 %v2619_v50  ;;  %v2709_v47 = vld [vmem:[%s3932_s1 + $0x7e0] ss:$24 sps:$4 sm:$0xff]  }
  0x31   :  { %1877 = vmatprep.subr.bf16.mxu0 %v2621_v51  ;;  %v2712_v50 = vld [vmem:[%s3932_s1 + $0x1e8] ss:$24 sps:$4 sm:$0xff]   ;;  %v2717_v51 = vld [vmem:[%s3932_s1 + $0x814] ss:$24 sps:$4 sm:$0xff]  }
  0x33   :  { %1835 = vmatpush1.bf16.msra.mxu1 %v2623_v52  ;;  %v2720_v52 = vld [vmem:[%s3932_s1 + $0x21c] ss:$24 sps:$4 sm:$0xff]  }
  0x34   :  { %1878 = vmatpush1.bf16.msra.mxu0 %v2624_v53  ;;  %1836 = vmatprep.subr.bf16.mxu1 %v2625_v54  ;;  %v2715_v53 = vld [vmem:[%s3932_s1 + $0x810] ss:$24 sps:$4 sm:$0xff]  }
  0x35   :  { %1879 = vmatprep.subr.bf16.mxu0 %v2627_v55  ;;  %v2718_v54 = vld [vmem:[%s3932_s1 + $0x218] ss:$24 sps:$4 sm:$0xff]   ;;  %v2723_v55 = vld [vmem:[%s3932_s1 + $0x844] ss:$24 sps:$4 sm:$0xff]  }
  0x37   :  { %1837 = vmatpush1.bf16.msra.mxu1 %v2629_v56  ;;  %v2726_v56 = vld [vmem:[%s3932_s1 + $0x24c] ss:$24 sps:$4 sm:$0xff]  }
  0x38   :  { %1880 = vmatpush1.bf16.msra.mxu0 %v2630_v57  ;;  %1838 = vmatprep.subr.bf16.mxu1 %v2631_v58  ;;  %v2721_v57 = vld [vmem:[%s3932_s1 + $0x840] ss:$24 sps:$4 sm:$0xff]  }
  0x39   :  { %1881 = vmatprep.subr.bf16.mxu0 %v2633_v59  ;;  %v2724_v58 = vld [vmem:[%s3932_s1 + $0x248] ss:$24 sps:$4 sm:$0xff]   ;;  %v2729_v59 = vld [vmem:[%s3932_s1 + $0x874] ss:$24 sps:$4 sm:$0xff]  }
  0x3b   :  { %1839 = vmatpush1.bf16.msra.mxu1 %v2635_v60  ;;  %v2732_v60 = vld [vmem:[%s3932_s1 + $0x27c] ss:$24 sps:$4 sm:$0xff]  }
  0x3c   :  { %1882 = vmatpush1.bf16.msra.mxu0 %v2636_v61  ;;  %1840 = vmatprep.subr.bf16.mxu1 %v2637_v62  ;;  %v2727_v61 = vld [vmem:[%s3932_s1 + $0x870] ss:$24 sps:$4 sm:$0xff]  }
  0x3d   :  { %1883 = vmatprep.subr.bf16.mxu0 %v2639_v63  ;;  %v2730_v62 = vld [vmem:[%s3932_s1 + $0x278] ss:$24 sps:$4 sm:$0xff]   ;;  %v2735_v63 = vld [vmem:[%s3932_s1 + $0x8a4] ss:$24 sps:$4 sm:$0xff]  }
  0x3f   :  { %1841 = vmatpush1.bf16.msra.mxu1 %v2641_v0  ;;  %v2738_v0 = vld [vmem:[%s3932_s1 + $0x2ac] ss:$24 sps:$4 sm:$0xff]  }
  0x40   :  { %1884 = vmatpush1.bf16.msra.mxu0 %v2642_v1  ;;  %1939 = vmatprep.subr.bf16.mxu1 %v2652_v3  ;;  %v2733_v1 = vld [vmem:[%s3932_s1 + $0x8a0] ss:$24 sps:$4 sm:$0xff]   ;;  %v2741_v3 = vld [vmem:[%s3932_s1 + $0x8d4] ss:$24 sps:$4 sm:$0xff]  }
  0x41   :  { %1896 = vmatprep.subr.bf16.mxu0 %v2649_v2  ;;  %v2736_v2 = vld [vmem:[%s3932_s1 + $0x2a8] ss:$24 sps:$4 sm:$0xff]  }
  0x42   :  { %1843 = vmatmul.mubr.bf16.vlgmr.msra.gmra.mrb[0].mxu1 %v3229_v6 }
  0x43   :  { %1886 = vmatmul.mubr.bf16.vlgmr.msra.gmra.mrb[0].mxu0 %v3234_v7  ;;  %1940 = vmatpush1.bf16.msra.mxu1 %v2650_v5  ;;  %v2739_v5 = vld [vmem:[%s3932_s1 + $0x8d0] ss:$24 sps:$4 sm:$0xff]  }
  0x44   :  { %1897 = vmatpush1.bf16.msra.mxu0 %v2647_v4  ;;  %1941 = vmatprep.subr.bf16.mxu1 %v2660_v9  ;;  %v2744_v4 = vld [vmem:[%s3932_s1 + $0x2dc] ss:$24 sps:$4 sm:$0xff]   ;;  %v2750_v9 = vld [vmem:[%s3932_s1 + $0x30c] ss:$24 sps:$4 sm:$0xff]  }
  0x45   :  { %1898 = vmatprep.subr.bf16.mxu0 %v2657_v8  ;;  %1971 = vmatprep.mubr.bf16.mxu1 %v3157_v48  ;;  %v2742_v8 = vld [vmem:[%s3932_s1 + $0x2d8] ss:$24 sps:$4 sm:$0xff]  }
  0x46   :  { %1928 = vmatprep.mubr.bf16.mxu0 %v3320_v34 }
  0x47   :  { %1942 = vmatpush1.bf16.msra.mxu1 %v2658_v11  ;;  %v3434_v11 = vld [vmem:[%s3933_s0 + $0x10] ss:$24 sps:$4 sm:$0xff]  }
  0x48   :  { %1899 = vmatpush1.bf16.msra.mxu0 %v2655_v10  ;;  %1943 = vmatprep.subr.bf16.mxu1 %v2666_v13  ;;  %v2753_v10 = vld [vmem:[%s3932_s1 + $0x14] ss:$24 sps:$4 sm:$0xff]   ;;  %v2751_v13 = vld [vmem:[%s3932_s1 + $0x10] ss:$24 sps:$4 sm:$0xff]  }
  0x49   :  { %1900 = vmatprep.subr.bf16.mxu0 %v2663_v12  ;;  %v2748_v12 = vld [vmem:[%s3932_s1 + $0x308] ss:$24 sps:$4 sm:$0xff]  }
  0x4b   :  { %1944 = vmatpush1.bf16.msra.mxu1 %v2664_v15  ;;  %v2759_v15 = vld [vmem:[%s3932_s1 + $0x44] ss:$24 sps:$4 sm:$0xff]  }
  0x4c   :  { %1901 = vmatpush1.bf16.msra.mxu0 %v2661_v14  ;;  %1945 = vmatprep.subr.bf16.mxu1 %v2672_v17  ;;  %v2756_v14 = vld [vmem:[%s3932_s1 + $0x33c] ss:$24 sps:$4 sm:$0xff]   ;;  %v2757_v17 = vld [vmem:[%s3932_s1 + $0x40] ss:$24 sps:$4 sm:$0xff]  }
  0x4d   :  { %1902 = vmatprep.subr.bf16.mxu0 %v2669_v16  ;;  %v2754_v16 = vld [vmem:[%s3932_s1 + $0x338] ss:$24 sps:$4 sm:$0xff]  }
  0x4f   :  { %1946 = vmatpush1.bf16.msra.mxu1 %v2670_v19  ;;  %v2765_v19 = vld [vmem:[%s3932_s1 + $0x74] ss:$24 sps:$4 sm:$0xff]  }
  0x50   :  { %1903 = vmatpush1.bf16.msra.mxu0 %v2667_v18  ;;  %1947 = vmatprep.subr.bf16.mxu1 %v2678_v21  ;;  %v2762_v18 = vld [vmem:[%s3932_s1 + $0x36c] ss:$24 sps:$4 sm:$0xff]   ;;  %v2763_v21 = vld [vmem:[%s3932_s1 + $0x70] ss:$24 sps:$4 sm:$0xff]  }
  0x51   :  { %1904 = vmatprep.subr.bf16.mxu0 %v2675_v20  ;;  %v2760_v20 = vld [vmem:[%s3932_s1 + $0x368] ss:$24 sps:$4 sm:$0xff]  }
  0x53   :  { %1948 = vmatpush1.bf16.msra.mxu1 %v2676_v23  ;;  %v2769_v23 = vld [vmem:[%s3932_s1 + $0xa0] ss:$24 sps:$4 sm:$0xff]  }
  0x54   :  { %1905 = vmatpush1.bf16.msra.mxu0 %v2673_v22  ;;  %1949 = vmatprep.subr.bf16.mxu1 %v2684_v25  ;;  %v2768_v22 = vld [vmem:[%s3932_s1 + $0x39c] ss:$24 sps:$4 sm:$0xff]  }
  0x55   :  { %1906 = vmatprep.subr.bf16.mxu0 %v2681_v24  ;;  %v2774_v24 = vld [vmem:[%s3932_s1 + $0x3cc] ss:$24 sps:$4 sm:$0xff]  }
  0x56   :  { %v2777_v25 = vld [vmem:[%s3932_s1 + $0xd4] ss:$24 sps:$4 sm:$0xff]  }
  0x57   :  { %1950 = vmatpush1.bf16.msra.mxu1 %v2682_v27  ;;  %v2775_v27 = vld [vmem:[%s3932_s1 + $0xd0] ss:$24 sps:$4 sm:$0xff]  }
  0x58   :  { %1907 = vmatpush1.bf16.msra.mxu0 %v2679_v26  ;;  %1951 = vmatprep.subr.bf16.mxu1 %v2690_v29  ;;  %v2772_v26 = vld [vmem:[%s3932_s1 + $0x3c8] ss:$24 sps:$4 sm:$0xff]   ;;  %v2783_v29 = vld [vmem:[%s3932_s1 + $0x104] ss:$24 sps:$4 sm:$0xff]  }
  0x59   :  { %1908 = vmatprep.subr.bf16.mxu0 %v2687_v28  ;;  %v2780_v28 = vld [vmem:[%s3932_s1 + $0x3fc] ss:$24 sps:$4 sm:$0xff]  }
  0x5b   :  { %1952 = vmatpush1.bf16.msra.mxu1 %v2688_v31  ;;  %v2781_v31 = vld [vmem:[%s3932_s1 + $0x100] ss:$24 sps:$4 sm:$0xff]  }
  0x5c   :  { %1909 = vmatpush1.bf16.msra.mxu0 %v2685_v30  ;;  %1953 = vmatprep.subr.bf16.mxu1 %v2696_v33  ;;  %v2778_v30 = vld [vmem:[%s3932_s1 + $0x3f8] ss:$24 sps:$4 sm:$0xff]   ;;  %v2789_v33 = vld [vmem:[%s3932_s1 + $0x134] ss:$24 sps:$4 sm:$0xff]  }
  0x5d   :  { %1910 = vmatprep.subr.bf16.mxu0 %v2693_v32  ;;  %v2786_v32 = vld [vmem:[%s3932_s1 + $0x42c] ss:$24 sps:$4 sm:$0xff]  }
  0x5f   :  { %1954 = vmatpush1.bf16.msra.mxu1 %v2694_v36  ;;  %v2787_v36 = vld [vmem:[%s3932_s1 + $0x130] ss:$24 sps:$4 sm:$0xff]  }
  0x60   :  { %1911 = vmatpush1.bf16.msra.mxu0 %v2691_v35  ;;  %1955 = vmatprep.subr.bf16.mxu1 %v2702_v38  ;;  %v2784_v35 = vld [vmem:[%s3932_s1 + $0x428] ss:$24 sps:$4 sm:$0xff]   ;;  %v2795_v38 = vld [vmem:[%s3932_s1 + $0x164] ss:$24 sps:$4 sm:$0xff]  }
  0x61   :  { %1912 = vmatprep.subr.bf16.mxu0 %v2699_v37  ;;  %v2792_v37 = vld [vmem:[%s3932_s1 + $0x45c] ss:$24 sps:$4 sm:$0xff]  }
  0x63   :  { %1956 = vmatpush1.bf16.msra.mxu1 %v2700_v40  ;;  %v2793_v40 = vld [vmem:[%s3932_s1 + $0x160] ss:$24 sps:$4 sm:$0xff]  }
  0x64   :  { %1913 = vmatpush1.bf16.msra.mxu0 %v2697_v39  ;;  %1957 = vmatprep.subr.bf16.mxu1 %v2708_v42  ;;  %v2790_v39 = vld [vmem:[%s3932_s1 + $0x458] ss:$24 sps:$4 sm:$0xff]   ;;  %v2801_v42 = vld [vmem:[%s3932_s1 + $0x194] ss:$24 sps:$4 sm:$0xff]  }
  0x65   :  { %1914 = vmatprep.subr.bf16.mxu0 %v2705_v41  ;;  %v2798_v41 = vld [vmem:[%s3932_s1 + $0x48c] ss:$24 sps:$4 sm:$0xff]  }
  0x67   :  { %1958 = vmatpush1.bf16.msra.mxu1 %v2706_v44  ;;  %v2799_v44 = vld [vmem:[%s3932_s1 + $0x190] ss:$24 sps:$4 sm:$0xff]  }
  0x68   :  { %1915 = vmatpush1.bf16.msra.mxu0 %v2703_v43  ;;  %1959 = vmatprep.subr.bf16.mxu1 %v2714_v46  ;;  %v2796_v43 = vld [vmem:[%s3932_s1 + $0x488] ss:$24 sps:$4 sm:$0xff]   ;;  %v2807_v46 = vld [vmem:[%s3932_s1 + $0x1c4] ss:$24 sps:$4 sm:$0xff]  }
  0x69   :  { %1916 = vmatprep.subr.bf16.mxu0 %v2711_v45  ;;  %v2804_v45 = vld [vmem:[%s3932_s1 + $0x4bc] ss:$24 sps:$4 sm:$0xff]  }
  0x6b   :  { %1960 = vmatpush1.bf16.msra.mxu1 %v2712_v50  ;;  %v2805_v50 = vld [vmem:[%s3932_s1 + $0x1c0] ss:$24 sps:$4 sm:$0xff]  }
  0x6c   :  { %1917 = vmatpush1.bf16.msra.mxu0 %v2709_v47  ;;  %1961 = vmatprep.subr.bf16.mxu1 %v2720_v52  ;;  %v2802_v47 = vld [vmem:[%s3932_s1 + $0x4b8] ss:$24 sps:$4 sm:$0xff]   ;;  %v2813_v52 = vld [vmem:[%s3932_s1 + $0x1f4] ss:$24 sps:$4 sm:$0xff]  }
  0x6d   :  { %1918 = vmatprep.subr.bf16.mxu0 %v2717_v51  ;;  %v2810_v51 = vld [vmem:[%s3932_s1 + $0x4ec] ss:$24 sps:$4 sm:$0xff]  }
  0x6f   :  { %1962 = vmatpush1.bf16.msra.mxu1 %v2718_v54  ;;  %v2811_v54 = vld [vmem:[%s3932_s1 + $0x1f0] ss:$24 sps:$4 sm:$0xff]  }
  0x70   :  { %1919 = vmatpush1.bf16.msra.mxu0 %v2715_v53  ;;  %1963 = vmatprep.subr.bf16.mxu1 %v2726_v56  ;;  %v2808_v53 = vld [vmem:[%s3932_s1 + $0x4e8] ss:$24 sps:$4 sm:$0xff]   ;;  %v2819_v56 = vld [vmem:[%s3932_s1 + $0x224] ss:$24 sps:$4 sm:$0xff]  }
  0x71   :  { %1920 = vmatprep.subr.bf16.mxu0 %v2723_v55  ;;  %v2816_v55 = vld [vmem:[%s3932_s1 + $0x51c] ss:$24 sps:$4 sm:$0xff]  }
  0x73   :  { %1964 = vmatpush1.bf16.msra.mxu1 %v2724_v58  ;;  %v2817_v58 = vld [vmem:[%s3932_s1 + $0x220] ss:$24 sps:$4 sm:$0xff]  }
  0x74   :  { %1921 = vmatpush1.bf16.msra.mxu0 %v2721_v57  ;;  %1965 = vmatprep.subr.bf16.mxu1 %v2732_v60  ;;  %v2814_v57 = vld [vmem:[%s3932_s1 + $0x518] ss:$24 sps:$4 sm:$0xff]   ;;  %v2825_v60 = vld [vmem:[%s3932_s1 + $0x254] ss:$24 sps:$4 sm:$0xff]  }
  0x75   :  { %1922 = vmatprep.subr.bf16.mxu0 %v2729_v59  ;;  %v2822_v59 = vld [vmem:[%s3932_s1 + $0x54c] ss:$24 sps:$4 sm:$0xff]  }
  0x77   :  { %1966 = vmatpush1.bf16.msra.mxu1 %v2730_v62  ;;  %v2823_v62 = vld [vmem:[%s3932_s1 + $0x250] ss:$24 sps:$4 sm:$0xff]  }
  0x78   :  { %1923 = vmatpush1.bf16.msra.mxu0 %v2727_v61  ;;  %1967 = vmatprep.subr.bf16.mxu1 %v2738_v0  ;;  %v2820_v61 = vld [vmem:[%s3932_s1 + $0x548] ss:$24 sps:$4 sm:$0xff]   ;;  %v2831_v0 = vld [vmem:[%s3932_s1 + $0x284] ss:$24 sps:$4 sm:$0xff]  }
  0x79   :  { %1924 = vmatprep.subr.bf16.mxu0 %v2735_v63  ;;  %v2828_v63 = vld [vmem:[%s3932_s1 + $0x57c] ss:$24 sps:$4 sm:$0xff]  }
  0x7b   :  { %1968 = vmatpush1.bf16.msra.mxu1 %v2736_v2  ;;  %v2829_v2 = vld [vmem:[%s3932_s1 + $0x280] ss:$24 sps:$4 sm:$0xff]  }
  0x7c   :  { %1925 = vmatpush1.bf16.msra.mxu0 %v2733_v1  ;;  %1969 = vmatprep.subr.bf16.mxu1 %v2744_v4  ;;  %v2826_v1 = vld [vmem:[%s3932_s1 + $0x578] ss:$24 sps:$4 sm:$0xff]   ;;  %v2837_v4 = vld [vmem:[%s3932_s1 + $0x2b4] ss:$24 sps:$4 sm:$0xff]  }
  0x7d   :  { %1926 = vmatprep.subr.bf16.mxu0 %v2741_v3  ;;  %v2834_v3 = vld [vmem:[%s3932_s1 + $0x5ac] ss:$24 sps:$4 sm:$0xff]  }
  0x7f   :  { %1970 = vmatpush1.bf16.msra.mxu1 %v2742_v8  ;;  %v2835_v8 = vld [vmem:[%s3932_s1 + $0x2b0] ss:$24 sps:$4 sm:$0xff]  }
  0x80   :  { %1927 = vmatpush1.bf16.msra.mxu0 %v2739_v5  ;;  %1982 = vmatprep.subr.bf16.mxu1 %v2750_v9  ;;  %v2832_v5 = vld [vmem:[%s3932_s1 + $0x5a8] ss:$24 sps:$4 sm:$0xff]   ;;  %v2840_v9 = vld [vmem:[%s3932_s1 + $0x5dc] ss:$24 sps:$4 sm:$0xff]  }
  0x81   :  { %2068 = vmatprep.subr.bf16.mxu0 %v2753_v10  ;;  %v2843_v10 = vld [vmem:[%s3932_s1 + $0x2e4] ss:$24 sps:$4 sm:$0xff]  }
  0x82   :  { %1972 = vmatmul.mubr.bf16.vlgmr.msra.gmra.mrb[4].mxu1 %v3229_v6 }
  0x83   :  { %1929 = vmatmul.mubr.bf16.vlgmr.msra.gmra.mrb[0].mxu0 %v3434_v11  ;;  %1983 = vmatpush1.bf16.msra.mxu1 %v2748_v12  ;;  %v2838_v12 = vld [vmem:[%s3932_s1 + $0x5d8] ss:$24 sps:$4 sm:$0xff]  }
  0x84   :  { %2069 = vmatpush1.bf16.msra.mxu0 %v2751_v13  ;;  %1984 = vmatprep.subr.bf16.mxu1 %v2756_v14  ;;  %v2841_v13 = vld [vmem:[%s3932_s1 + $0x2e0] ss:$24 sps:$4 sm:$0xff]   ;;  %v2846_v14 = vld [vmem:[%s3932_s1 + $0x60c] ss:$24 sps:$4 sm:$0xff]  }
  0x85   :  { %2070 = vmatprep.subr.bf16.mxu0 %v2759_v15  ;;  %2014 = vmatprep.mubr.bf16.mxu1 %v3162_v49  ;;  %v2766_v49 = vld [vmem:[%s3932_s1 + $0x398] ss:$24 sps:$4 sm:$0xff]   ;;  %v2849_v15 = vld [vmem:[%s3932_s1 + $0x314] ss:$24 sps:$4 sm:$0xff]  }
  0x86   :  { %2100 = vmatprep.mubr.bf16.mxu0 %v3157_v48  ;;  %v2771_v48 = vld [vmem:[%s3932_s1 + $0xa4] ss:$24 sps:$4 sm:$0xff]  }
  0x87   :  { %1985 = vmatpush1.bf16.msra.mxu1 %v2754_v16  ;;  %v2844_v16 = vld [vmem:[%s3932_s1 + $0x608] ss:$24 sps:$4 sm:$0xff]  }
  0x88   :  { %2071 = vmatpush1.bf16.msra.mxu0 %v2757_v17  ;;  %1986 = vmatprep.subr.bf16.mxu1 %v2762_v18  ;;  %v2847_v17 = vld [vmem:[%s3932_s1 + $0x310] ss:$24 sps:$4 sm:$0xff]   ;;  %v2852_v18 = vld [vmem:[%s3932_s1 + $0x63c] ss:$24 sps:$4 sm:$0xff]  }
  0x89   :  { %2072 = vmatprep.subr.bf16.mxu0 %v2765_v19  ;;  %v2855_v19 = vld [vmem:[%s3932_s1 + $0x344] ss:$24 sps:$4 sm:$0xff]  }
  0x8b   :  { %1987 = vmatpush1.bf16.msra.mxu1 %v2760_v20  ;;  %v2850_v20 = vld [vmem:[%s3932_s1 + $0x638] ss:$24 sps:$4 sm:$0xff]  }
  0x8c   :  { %2073 = vmatpush1.bf16.msra.mxu0 %v2763_v21  ;;  %1988 = vmatprep.subr.bf16.mxu1 %v2768_v22  ;;  %v2853_v21 = vld [vmem:[%s3932_s1 + $0x340] ss:$24 sps:$4 sm:$0xff]   ;;  %v2858_v22 = vld [vmem:[%s3932_s1 + $0x66c] ss:$24 sps:$4 sm:$0xff]  }
  0x8d   :  { %2074 = vmatprep.subr.bf16.mxu0 %v2771_v48  ;;  %v2856_v48 = vld [vmem:[%s3932_s1 + $0x668] ss:$24 sps:$4 sm:$0xff]  }
  0x8f   :  { %1989 = vmatpush1.bf16.msra.mxu1 %v2766_v49  ;;  %v2859_v49 = vld [vmem:[%s3932_s1 + $0x370] ss:$24 sps:$4 sm:$0xff]  }
  0x90   :  { %2075 = vmatpush1.bf16.msra.mxu0 %v2769_v23  ;;  %1990 = vmatprep.subr.bf16.mxu1 %v2774_v24  ;;  %v2864_v23 = vld [vmem:[%s3932_s1 + $0x69c] ss:$24 sps:$4 sm:$0xff]  }
  0x91   :  { %2076 = vmatprep.subr.bf16.mxu0 %v2777_v25  ;;  %v2867_v24 = vld [vmem:[%s3932_s1 + $0x3a4] ss:$24 sps:$4 sm:$0xff]   ;;  %v2862_v25 = vld [vmem:[%s3932_s1 + $0x698] ss:$24 sps:$4 sm:$0xff]  }
  0x93   :  { %1991 = vmatpush1.bf16.msra.mxu1 %v2772_v26  ;;  %v2865_v26 = vld [vmem:[%s3932_s1 + $0x3a0] ss:$24 sps:$4 sm:$0xff]  }
  0x94   :  { %2077 = vmatpush1.bf16.msra.mxu0 %v2775_v27  ;;  %1992 = vmatprep.subr.bf16.mxu1 %v2780_v28  ;;  %v2870_v27 = vld [vmem:[%s3932_s1 + $0x6cc] ss:$24 sps:$4 sm:$0xff]  }
  0x95   :  { %2078 = vmatprep.subr.bf16.mxu0 %v2783_v29  ;;  %v2873_v28 = vld [vmem:[%s3932_s1 + $0x3d4] ss:$24 sps:$4 sm:$0xff]   ;;  %v2868_v29 = vld [vmem:[%s3932_s1 + $0x6c8] ss:$24 sps:$4 sm:$0xff]  }
  0x97   :  { %1993 = vmatpush1.bf16.msra.mxu1 %v2778_v30  ;;  %v2871_v30 = vld [vmem:[%s3932_s1 + $0x3d0] ss:$24 sps:$4 sm:$0xff]  }
  0x98   :  { %2079 = vmatpush1.bf16.msra.mxu0 %v2781_v31  ;;  %1994 = vmatprep.subr.bf16.mxu1 %v2786_v32  ;;  %v2876_v31 = vld [vmem:[%s3932_s1 + $0x6fc] ss:$24 sps:$4 sm:$0xff]  }
  0x99   :  { %2080 = vmatprep.subr.bf16.mxu0 %v2789_v33  ;;  %v2879_v32 = vld [vmem:[%s3932_s1 + $0x404] ss:$24 sps:$4 sm:$0xff]   ;;  %v2874_v33 = vld [vmem:[%s3932_s1 + $0x6f8] ss:$24 sps:$4 sm:$0xff]  }
  0x9b   :  { %1995 = vmatpush1.bf16.msra.mxu1 %v2784_v35  ;;  %v2877_v35 = vld [vmem:[%s3932_s1 + $0x400] ss:$24 sps:$4 sm:$0xff]  }
  0x9c   :  { %2081 = vmatpush1.bf16.msra.mxu0 %v2787_v36  ;;  %1996 = vmatprep.subr.bf16.mxu1 %v2792_v37  ;;  %v2882_v36 = vld [vmem:[%s3932_s1 + $0x72c] ss:$24 sps:$4 sm:$0xff]  }
  0x9d   :  { %2082 = vmatprep.subr.bf16.mxu0 %v2795_v38  ;;  %v2885_v37 = vld [vmem:[%s3932_s1 + $0x434] ss:$24 sps:$4 sm:$0xff]   ;;  %v2880_v38 = vld [vmem:[%s3932_s1 + $0x728] ss:$24 sps:$4 sm:$0xff]  }
  0x9f   :  { %1997 = vmatpush1.bf16.msra.mxu1 %v2790_v39  ;;  %v2883_v39 = vld [vmem:[%s3932_s1 + $0x430] ss:$24 sps:$4 sm:$0xff]  }
  0xa0   :  { %2083 = vmatpush1.bf16.msra.mxu0 %v2793_v40  ;;  %1998 = vmatprep.subr.bf16.mxu1 %v2798_v41  ;;  %v2888_v40 = vld [vmem:[%s3932_s1 + $0x75c] ss:$24 sps:$4 sm:$0xff]  }
  0xa1   :  { %2084 = vmatprep.subr.bf16.mxu0 %v2801_v42  ;;  %v2891_v41 = vld [vmem:[%s3932_s1 + $0x464] ss:$24 sps:$4 sm:$0xff]   ;;  %v2886_v42 = vld [vmem:[%s3932_s1 + $0x758] ss:$24 sps:$4 sm:$0xff]  }
  0xa3   :  { %1999 = vmatpush1.bf16.msra.mxu1 %v2796_v43  ;;  %v2889_v43 = vld [vmem:[%s3932_s1 + $0x460] ss:$24 sps:$4 sm:$0xff]  }
  0xa4   :  { %2085 = vmatpush1.bf16.msra.mxu0 %v2799_v44  ;;  %2000 = vmatprep.subr.bf16.mxu1 %v2804_v45  ;;  %v2894_v44 = vld [vmem:[%s3932_s1 + $0x78c] ss:$24 sps:$4 sm:$0xff]  }
  0xa5   :  { %2086 = vmatprep.subr.bf16.mxu0 %v2807_v46  ;;  %v2897_v45 = vld [vmem:[%s3932_s1 + $0x494] ss:$24 sps:$4 sm:$0xff]   ;;  %v2892_v46 = vld [vmem:[%s3932_s1 + $0x788] ss:$24 sps:$4 sm:$0xff]  }
  0xa7   :  { %2001 = vmatpush1.bf16.msra.mxu1 %v2802_v47  ;;  %v2895_v47 = vld [vmem:[%s3932_s1 + $0x490] ss:$24 sps:$4 sm:$0xff]  }
  0xa8   :  { %2087 = vmatpush1.bf16.msra.mxu0 %v2805_v50  ;;  %2002 = vmatprep.subr.bf16.mxu1 %v2810_v51  ;;  %v2900_v50 = vld [vmem:[%s3932_s1 + $0x7bc] ss:$24 sps:$4 sm:$0xff]  }
  0xa9   :  { %2088 = vmatprep.subr.bf16.mxu0 %v2813_v52  ;;  %v2903_v51 = vld [vmem:[%s3932_s1 + $0x4c4] ss:$24 sps:$4 sm:$0xff]   ;;  %v2898_v52 = vld [vmem:[%s3932_s1 + $0x7b8] ss:$24 sps:$4 sm:$0xff]  }
  0xab   :  { %2003 = vmatpush1.bf16.msra.mxu1 %v2808_v53  ;;  %v2901_v53 = vld [vmem:[%s3932_s1 + $0x4c0] ss:$24 sps:$4 sm:$0xff]  }
  0xac   :  { %2089 = vmatpush1.bf16.msra.mxu0 %v2811_v54  ;;  %2004 = vmatprep.subr.bf16.mxu1 %v2816_v55  ;;  %v2906_v54 = vld [vmem:[%s3932_s1 + $0x7ec] ss:$24 sps:$4 sm:$0xff]  }
  0xad   :  { %2090 = vmatprep.subr.bf16.mxu0 %v2819_v56  ;;  %v2909_v55 = vld [vmem:[%s3932_s1 + $0x4f4] ss:$24 sps:$4 sm:$0xff]   ;;  %v2904_v56 = vld [vmem:[%s3932_s1 + $0x7e8] ss:$24 sps:$4 sm:$0xff]  }
  0xaf   :  { %2005 = vmatpush1.bf16.msra.mxu1 %v2814_v57  ;;  %v2907_v57 = vld [vmem:[%s3932_s1 + $0x4f0] ss:$24 sps:$4 sm:$0xff]  }
  0xb0   :  { %2091 = vmatpush1.bf16.msra.mxu0 %v2817_v58  ;;  %2006 = vmatprep.subr.bf16.mxu1 %v2822_v59  ;;  %v2912_v58 = vld [vmem:[%s3932_s1 + $0x81c] ss:$24 sps:$4 sm:$0xff]  }
  0xb1   :  { %2092 = vmatprep.subr.bf16.mxu0 %v2825_v60  ;;  %v2915_v59 = vld [vmem:[%s3932_s1 + $0x524] ss:$24 sps:$4 sm:$0xff]   ;;  %v2910_v60 = vld [vmem:[%s3932_s1 + $0x818] ss:$24 sps:$4 sm:$0xff]  }
  0xb3   :  { %2007 = vmatpush1.bf16.msra.mxu1 %v2820_v61  ;;  %v2913_v61 = vld [vmem:[%s3932_s1 + $0x520] ss:$24 sps:$4 sm:$0xff]  }
  0xb4   :  { %2093 = vmatpush1.bf16.msra.mxu0 %v2823_v62  ;;  %2008 = vmatprep.subr.bf16.mxu1 %v2828_v63  ;;  %v2918_v62 = vld [vmem:[%s3932_s1 + $0x84c] ss:$24 sps:$4 sm:$0xff]  }
  0xb5   :  { %2094 = vmatprep.subr.bf16.mxu0 %v2831_v0  ;;  %v2921_v63 = vld [vmem:[%s3932_s1 + $0x554] ss:$24 sps:$4 sm:$0xff]   ;;  %v2916_v0 = vld [vmem:[%s3932_s1 + $0x848] ss:$24 sps:$4 sm:$0xff]  }
  0xb7   :  { %2009 = vmatpush1.bf16.msra.mxu1 %v2826_v1  ;;  %v2919_v1 = vld [vmem:[%s3932_s1 + $0x550] ss:$24 sps:$4 sm:$0xff]  }
  0xb8   :  { %2095 = vmatpush1.bf16.msra.mxu0 %v2829_v2  ;;  %2010 = vmatprep.subr.bf16.mxu1 %v2834_v3  ;;  %v2924_v2 = vld [vmem:[%s3932_s1 + $0x87c] ss:$24 sps:$4 sm:$0xff]  }
  0xb9   :  { %2096 = vmatprep.subr.bf16.mxu0 %v2837_v4  ;;  %v2927_v3 = vld [vmem:[%s3932_s1 + $0x584] ss:$24 sps:$4 sm:$0xff]   ;;  %v2922_v4 = vld [vmem:[%s3932_s1 + $0x878] ss:$24 sps:$4 sm:$0xff]  }
  0xbb   :  { %2011 = vmatpush1.bf16.msra.mxu1 %v2832_v5  ;;  %v2925_v5 = vld [vmem:[%s3932_s1 + $0x580] ss:$24 sps:$4 sm:$0xff]  }
  0xbc   :  { %2097 = vmatpush1.bf16.msra.mxu0 %v2835_v8  ;;  %2012 = vmatprep.subr.bf16.mxu1 %v2840_v9  ;;  %v2930_v8 = vld [vmem:[%s3932_s1 + $0x8ac] ss:$24 sps:$4 sm:$0xff]  }
  0xbd   :  { %2098 = vmatprep.subr.bf16.mxu0 %v2843_v10  ;;  %v2933_v9 = vld [vmem:[%s3932_s1 + $0x5b4] ss:$24 sps:$4 sm:$0xff]   ;;  %v2928_v10 = vld [vmem:[%s3932_s1 + $0x8a8] ss:$24 sps:$4 sm:$0xff]  }
  0xbf   :  { %2013 = vmatpush1.bf16.msra.mxu1 %v2838_v12  ;;  %v2931_v12 = vld [vmem:[%s3932_s1 + $0x5b0] ss:$24 sps:$4 sm:$0xff]  }
  0xc0   :  { %2099 = vmatpush1.bf16.msra.mxu0 %v2841_v13  ;;  %2025 = vmatprep.subr.bf16.mxu1 %v2846_v14  ;;  %v2936_v13 = vld [vmem:[%s3932_s1 + $0x8dc] ss:$24 sps:$4 sm:$0xff]  }
  0xc1   :  { %2111 = vmatprep.subr.bf16.mxu0 %v2849_v15  ;;  %v2939_v14 = vld [vmem:[%s3932_s1 + $0x5e4] ss:$24 sps:$4 sm:$0xff]   ;;  %v2934_v15 = vld [vmem:[%s3932_s1 + $0x8d8] ss:$24 sps:$4 sm:$0xff]  }
  0xc2   :  { %2015 = vmatmul.mubr.bf16.vlgmr.msra.gmra.mrb[4].mxu1 %v3234_v7  ;;  %v2988_v7 = vld [vmem:[%s3933_s0 + $0xc] ss:$24 sps:$4 sm:$0xff]  }
  0xc3   :  { %2101 = vmatmul.mubr.bf16.vlgmr.msra.gmra.mrb[4].mxu0 %v3229_v6  ;;  %2026 = vmatpush1.bf16.msra.mxu1 %v2844_v16  ;;  %v2861_v6 = vld [vmem:[%s3932_s1 + $0x374] ss:$24 sps:$4 sm:$0xff]   ;;  %v2937_v16 = vld [vmem:[%s3932_s1 + $0x5e0] ss:$24 sps:$4 sm:$0xff]  }
  0xc4   :  { %2112 = vmatpush1.bf16.msra.mxu0 %v2847_v17  ;;  %2027 = vmatprep.subr.bf16.mxu1 %v2852_v18  ;;  %v2942_v17 = vld [vmem:[%s3932_s1 + $0x614] ss:$24 sps:$4 sm:$0xff]   ;;  %v2940_v18 = vld [vmem:[%s3932_s1 + $0x610] ss:$24 sps:$4 sm:$0xff]  }
  0xc5   :  { %2113 = vmatprep.subr.bf16.mxu0 %v2855_v19  ;;  %2057 = vmatprep.mubr.bf16.mxu1 %v3320_v34  ;;  %v2945_v19 = vld [vmem:[%s3932_s1 + $0x644] ss:$24 sps:$4 sm:$0xff]  }
  0xc6   :  { %2143 = vmatprep.mubr.bf16.mxu0 %v2988_v7  ;;  %v2951_v7 = vld [vmem:[%s3932_s1 + $0x6a4] ss:$24 sps:$4 sm:$0xff]  }
  0xc7   :  { %2028 = vmatpush1.bf16.msra.mxu1 %v2850_v20  ;;  %v2989_v20 = vld [vmem:[%s3933_s0 + $0x8] ss:$24 sps:$4 sm:$0xff]  }
  0xc8   :  { %2114 = vmatpush1.bf16.msra.mxu0 %v2853_v21  ;;  %2029 = vmatprep.subr.bf16.mxu1 %v2858_v22  ;;  %v2943_v21 = vld [vmem:[%s3932_s1 + $0x640] ss:$24 sps:$4 sm:$0xff]   ;;  %v2948_v22 = vld [vmem:[%s3932_s1 + $0x674] ss:$24 sps:$4 sm:$0xff]  }
  0xc9   :  { %2115 = vmatprep.subr.bf16.mxu0 %v2861_v6  ;;  %v2946_v6 = vld [vmem:[%s3932_s1 + $0x670] ss:$24 sps:$4 sm:$0xff]  }
  0xcb   :  { %2030 = vmatpush1.bf16.msra.mxu1 %v2856_v48  ;;  %v2954_v48 = vld [vmem:[%s3932_s1 + $0x6d4] ss:$24 sps:$4 sm:$0xff]  }
  0xcc   :  { %2116 = vmatpush1.bf16.msra.mxu0 %v2859_v49  ;;  %2031 = vmatprep.subr.bf16.mxu1 %v2864_v23  ;;  %v2952_v49 = vld [vmem:[%s3932_s1 + $0x6d0] ss:$24 sps:$4 sm:$0xff]   ;;  %v2957_v23 = vld [vmem:[%s3932_s1 + $0x704] ss:$24 sps:$4 sm:$0xff]  }
  0xcd   :  { %2117 = vmatprep.subr.bf16.mxu0 %v2867_v24  ;;  %v2955_v24 = vld [vmem:[%s3932_s1 + $0x700] ss:$24 sps:$4 sm:$0xff]  }
  0xcf   :  { %2032 = vmatpush1.bf16.msra.mxu1 %v2862_v25  ;;  %v2960_v25 = vld [vmem:[%s3932_s1 + $0x734] ss:$24 sps:$4 sm:$0xff]  }
  0xd0   :  { %2118 = vmatpush1.bf16.msra.mxu0 %v2865_v26  ;;  %2033 = vmatprep.subr.bf16.mxu1 %v2870_v27 }
  0xd1   :  { %2119 = vmatprep.subr.bf16.mxu0 %v2873_v28  ;;  %v2958_v28 = vld [vmem:[%s3932_s1 + $0x730] ss:$24 sps:$4 sm:$0xff]  }
  0xd3   :  { %2034 = vmatpush1.bf16.msra.mxu1 %v2868_v29 }
  0xd4   :  { %2120 = vmatpush1.bf16.msra.mxu0 %v2871_v30  ;;  %2035 = vmatprep.subr.bf16.mxu1 %v2876_v31  ;;  %v2963_v30 = vld [vmem:[%s3932_s1 + $0x764] ss:$24 sps:$4 sm:$0xff]  }
  0xd5   :  { %2121 = vmatprep.subr.bf16.mxu0 %v2879_v32  ;;  %v2961_v32 = vld [vmem:[%s3932_s1 + $0x760] ss:$24 sps:$4 sm:$0xff]  }
  0xd7   :  { %2036 = vmatpush1.bf16.msra.mxu1 %v2874_v33  ;;  %v2966_v33 = vld [vmem:[%s3932_s1 + $0x794] ss:$24 sps:$4 sm:$0xff]  }
  0xd8   :  { %2122 = vmatpush1.bf16.msra.mxu0 %v2877_v35  ;;  %2037 = vmatprep.subr.bf16.mxu1 %v2882_v36  ;;  %v2964_v35 = vld [vmem:[%s3932_s1 + $0x790] ss:$24 sps:$4 sm:$0xff]   ;;  %v2969_v36 = vld [vmem:[%s3932_s1 + $0x7c4] ss:$24 sps:$4 sm:$0xff]  }
  0xd9   :  { %2123 = vmatprep.subr.bf16.mxu0 %v2885_v37  ;;  %v2967_v37 = vld [vmem:[%s3932_s1 + $0x7c0] ss:$24 sps:$4 sm:$0xff]  }
  0xdb   :  { %2038 = vmatpush1.bf16.msra.mxu1 %v2880_v38  ;;  %v2972_v38 = vld [vmem:[%s3932_s1 + $0x7f4] ss:$24 sps:$4 sm:$0xff]  }
  0xdc   :  { %2124 = vmatpush1.bf16.msra.mxu0 %v2883_v39  ;;  %2039 = vmatprep.subr.bf16.mxu1 %v2888_v40  ;;  %v2970_v39 = vld [vmem:[%s3932_s1 + $0x7f0] ss:$24 sps:$4 sm:$0xff]   ;;  %v2975_v40 = vld [vmem:[%s3932_s1 + $0x824] ss:$24 sps:$4 sm:$0xff]  }
  0xdd   :  { %2125 = vmatprep.subr.bf16.mxu0 %v2891_v41  ;;  %v2973_v41 = vld [vmem:[%s3932_s1 + $0x820] ss:$24 sps:$4 sm:$0xff]  }
  0xdf   :  { %2040 = vmatpush1.bf16.msra.mxu1 %v2886_v42  ;;  %v2978_v42 = vld [vmem:[%s3932_s1 + $0x854] ss:$24 sps:$4 sm:$0xff]  }
  0xe0   :  { %2126 = vmatpush1.bf16.msra.mxu0 %v2889_v43  ;;  %2041 = vmatprep.subr.bf16.mxu1 %v2894_v44  ;;  %v2976_v43 = vld [vmem:[%s3932_s1 + $0x850] ss:$24 sps:$4 sm:$0xff]   ;;  %v2981_v44 = vld [vmem:[%s3932_s1 + $0x884] ss:$24 sps:$4 sm:$0xff]  }
  0xe1   :  { %2127 = vmatprep.subr.bf16.mxu0 %v2897_v45  ;;  %v2979_v45 = vld [vmem:[%s3932_s1 + $0x880] ss:$24 sps:$4 sm:$0xff]  }
  0xe3   :  { %2042 = vmatpush1.bf16.msra.mxu1 %v2892_v46  ;;  %v2984_v46 = vld [vmem:[%s3932_s1 + $0x8b4] ss:$24 sps:$4 sm:$0xff]  }
  0xe4   :  { %2128 = vmatpush1.bf16.msra.mxu0 %v2895_v47  ;;  %2043 = vmatprep.subr.bf16.mxu1 %v2900_v50  ;;  %v2982_v47 = vld [vmem:[%s3932_s1 + $0x8b0] ss:$24 sps:$4 sm:$0xff]   ;;  %v2987_v50 = vld [vmem:[%s3932_s1 + $0x8e4] ss:$24 sps:$4 sm:$0xff]  }
  0xe5   :  { %2129 = vmatprep.subr.bf16.mxu0 %v2903_v51  ;;  %v2985_v51 = vld [vmem:[%s3932_s1 + $0x8e0] ss:$24 sps:$4 sm:$0xff]  }
  0xe7   :  { %2044 = vmatpush1.bf16.msra.mxu1 %v2898_v52  ;;  %v310_v52 = vlaneseq }
  0xe8   :  { %2130 = vmatpush1.bf16.msra.mxu0 %v2901_v53  ;;  %2045 = vmatprep.subr.bf16.mxu1 %v2906_v54 }
  0xe9   :  { %2131 = vmatprep.subr.bf16.mxu0 %v2909_v55  ;;  %v311_v53 = vshrl.u32 %v310_v52, 7  ;;  %v308_v55 = vld [vmem:[%s3934_s2] sm:$0x3f] }
  0xeb   :  { %2046 = vmatpush1.bf16.msra.mxu1 %v2904_v56  ;;  %v312_v54 = vsub.s32 0, %v311_v53  ;;  %v316_v56 = vsub.s32 1, %v311_v53 }
  0xec   :  { %2132 = vmatpush1.bf16.msra.mxu0 %v2907_v57  ;;  %2047 = vmatprep.subr.bf16.mxu1 %v2912_v58 }
  0xed   :  { %2133 = vmatprep.subr.bf16.mxu0 %v2915_v59  ;;  %v313_v57 = vrot.slane %v308_v55, %v312_v54  ;;  %v317_v58 = vrot.slane %v308_v55, %v316_v56 }
  0xef   :  { %2048 = vmatpush1.bf16.msra.mxu1 %v2910_v60 }
  0xf0   :  { %2134 = vmatpush1.bf16.msra.mxu0 %v2913_v61  ;;  %2049 = vmatprep.subr.bf16.mxu1 %v2918_v62 }
  0xf1   :  { %2135 = vmatprep.subr.bf16.mxu0 %v2921_v63 }
  0xf3   :  { %2050 = vmatpush1.bf16.msra.mxu1 %v2916_v0 }
  0xf4   :  { %2136 = vmatpush1.bf16.msra.mxu0 %v2919_v1  ;;  %2051 = vmatprep.subr.bf16.mxu1 %v2924_v2 }
  0xf5   :  { %2137 = vmatprep.subr.bf16.mxu0 %v2927_v3 }
  0xf7   :  { %2052 = vmatpush1.bf16.msra.mxu1 %v2922_v4 }
  0xf8   :  { %2138 = vmatpush1.bf16.msra.mxu0 %v2925_v5  ;;  %2053 = vmatprep.subr.bf16.mxu1 %v2930_v8 }
  0xf9   :  { %2139 = vmatprep.subr.bf16.mxu0 %v2933_v9 }
  0xfb   :  { %2054 = vmatpush1.bf16.msra.mxu1 %v2928_v10 }
  0xfc   :  { %2140 = vmatpush1.bf16.msra.mxu0 %v2931_v12  ;;  %2055 = vmatprep.subr.bf16.mxu1 %v2936_v13  ;;  %v320_v12 = vsub.s32 2, %v311_v53  ;;  %v324_v13 = vsub.s32 3, %v311_v53 }
  0xfd   :  { %2141 = vmatprep.subr.bf16.mxu0 %v2939_v14 }
  0xfe   :  { %v321_v14 = vrot.slane %v308_v55, %v320_v12 }
  0xff   :  { %2056 = vmatpush1.bf16.msra.mxu1 %v2934_v15 }
 0x100   :  { %2142 = vmatpush1.bf16.msra.mxu0 %v2937_v16  ;;  %v325_v16 = vrot.slane %v308_v55, %v324_v13 }
 0x101   :  { %2154 = vmatprep.subr.bf16.mxu0 %v2942_v17 }
 0x102   :  { %2058 = vmatmul.mubr.bf16.vlgmr.msra.gmra.mrb[4].mxu1 %v3434_v11 }
 0x103   :  { %2144 = vmatmul.mubr.bf16.vlgmr.msra.gmra.mrb[4].mxu0 %v2989_v20 }
 0x104   :  { %2155 = vmatpush1.bf16.msra.mxu0 %v2940_v18  ;;  %2186 = vmatprep.mubr.bf16.mxu0 %v3320_v34  ;;  %v2949_v34 = vld [vmem:[%s3932_s1 + $0x6a0] ss:$24 sps:$4 sm:$0xff]  }
 0x105   :  { %2156 = vmatprep.subr.bf16.mxu0 %v2945_v19 }
 0x108   :  { %2157 = vmatpush1.bf16.msra.mxu0 %v2943_v21 }
 0x109   :  { %2158 = vmatprep.subr.bf16.mxu0 %v2948_v22 }
 0x10c   :  { %2159 = vmatpush1.bf16.msra.mxu0 %v2946_v6 }
 0x10d   :  { %2160 = vmatprep.subr.bf16.mxu0 %v2951_v7 }
 0x110   :  { %2161 = vmatpush1.bf16.msra.mxu0 %v2949_v34 }
 0x111   :  { %2162 = vmatprep.subr.bf16.mxu0 %v2954_v48 }
 0x114   :  { %2163 = vmatpush1.bf16.msra.mxu0 %v2952_v49 }
 0x115   :  { %2164 = vmatprep.subr.bf16.mxu0 %v2957_v23  ;;  %v1844_v26 = vpop.f32.mrb[0].mxu1  ;;  %v328_v23 = vsub.s32 4, %v311_v53 }
 0x116   :  { %v1846_v27 = vpop.f32.mrb[1].mxu1  ;;  %v1845_v59 = vadd.f32 %v1844_v26, %v313_v57 }
 0x117   :  { %v1848_v29 = vpop.f32.mrb[2].mxu1  ;;  %v1847_v60 = vadd.f32 %v1846_v27, %v317_v58 }
 0x118   :  { %2165 = vmatpush1.bf16.msra.mxu0 %v2955_v24  ;;  %v1850_v31 = vpop.f32.mrb[3].mxu1  ;;  %v1849_v62 = vadd.f32 %v1848_v29, %v313_v57  ;;  %v332_v24 = vsub.s32 5, %v311_v53 }
 0x119   :  { %2166 = vmatprep.subr.bf16.mxu0 %v2960_v25  ;;  %v1851_v1 = vadd.f32 %v1850_v31, %v317_v58  ;;  %v329_v25 = vrot.slane %v308_v55, %v328_v23 }
 0x11a   :  { %v333_v27 = vrot.slane %v308_v55, %v332_v24 }
 0x11c   :  { %2167 = vmatpush1.bf16.msra.mxu0 %v2958_v28 }
 0x11d   :  { %2168 = vmatprep.subr.bf16.mxu0 %v2963_v30 }
 0x120   :  { %2169 = vmatpush1.bf16.msra.mxu0 %v2961_v32 }
 0x121   :  { %2170 = vmatprep.subr.bf16.mxu0 %v2966_v33 }
 0x124   :  { %2171 = vmatpush1.bf16.msra.mxu0 %v2964_v35 }
 0x125   :  { %2172 = vmatprep.subr.bf16.mxu0 %v2969_v36 }
 0x128   :  { %2173 = vmatpush1.bf16.msra.mxu0 %v2967_v37 }
 0x129   :  { %2174 = vmatprep.subr.bf16.mxu0 %v2972_v38 }
 0x12c   :  { %2175 = vmatpush1.bf16.msra.mxu0 %v2970_v39 }
 0x12d   :  { %2176 = vmatprep.subr.bf16.mxu0 %v2975_v40 }
 0x130   :  { %2177 = vmatpush1.bf16.msra.mxu0 %v2973_v41 }
 0x131   :  { %2178 = vmatprep.subr.bf16.mxu0 %v2978_v42 }
 0x134   :  { %2179 = vmatpush1.bf16.msra.mxu0 %v2976_v43 }
 0x135   :  { %2180 = vmatprep.subr.bf16.mxu0 %v2981_v44 }
 0x138   :  { %2181 = vmatpush1.bf16.msra.mxu0 %v2979_v45 }
 0x139   :  { %2182 = vmatprep.subr.bf16.mxu0 %v2984_v46 }
 0x13c   :  { %2183 = vmatpush1.bf16.msra.mxu0 %v2982_v47 }
 0x13d   :  { %2184 = vmatprep.subr.bf16.mxu0 %v2987_v50 }
 0x140   :  { %2185 = vmatpush1.bf16.msra.mxu0 %v2985_v51 }
 0x143   :  { %2187 = vmatmul.mubr.bf16.vlgmr.msra.gmra.mrb[4].mxu0 %v3434_v11 }
 0x156   :  { %v1930_v61 = vpop.f32.mrb[0].mxu0 }
 0x157   :  { %v2512_v63 = vadd.f32 %v1930_v61, %v1845_v59  ;;  %v1932_v0 = vpop.f32.mrb[1].mxu0 }
 0x158   :  { %v2514_v2 = vadd.f32 %v1932_v0, %v1847_v60  ;;  %v1934_v3 = vpop.f32.mrb[2].mxu0 }
 0x159   :  { %v2516_v11 = vadd.f32 %v1934_v3, %v1849_v62  ;;  %v1936_v4 = vpop.f32.mrb[3].mxu0 }
 0x15a   :  { %v2518_v5 = vadd.f32 %v1936_v4, %v1851_v1 }
 0x15b   :  { %v2197_v8 = vmul.f32 %v2516_v11, %v2512_v63 }
 0x15c   :  { %v2198_v9 = vmul.f32 %v2518_v5, %v2514_v2 }
 0x15e   :  { %v2203_v10 = vadd.f32 %v2198_v9, %v2197_v8 }
 0x1d5   :  { %v2059_v15 = vpop.f32.mrb[4].mxu1 }
 0x1d6   :  { %v2061_v17 = vpop.f32.mrb[5].mxu1  ;;  %v2519_v19 = vadd.f32 %v2059_v15, %v321_v14 }
 0x1d7   :  { %v2063_v18 = vpop.f32.mrb[6].mxu1  ;;  %v2520_v22 = vadd.f32 %v2061_v17, %v325_v16 }
 0x1d8   :  { %v2521_v20 = vadd.f32 %v2063_v18, %v321_v14  ;;  %v2065_v21 = vpop.f32.mrb[7].mxu1 }
 0x1d9   :  { %v2522_v6 = vadd.f32 %v2065_v21, %v325_v16 }
 0x1da   :  { %v2199_v7 = vmul.f32 %v2521_v20, %v2519_v19 }
 0x1db   :  { %v2200_v34 = vmul.f32 %v2522_v6, %v2520_v22 }
 0x1dc   :  { %v2204_v48 = vadd.f32 %v2203_v10, %v2199_v7 }
 0x1de   :  { %v2205_v49 = vadd.f32 %v2204_v48, %v2200_v34 }
 0x216   :  { %v2188_v26 = vpop.f32.mrb[4].mxu0 }
 0x217   :  { %v2190_v28 = vpop.f32.mrb[5].mxu0  ;;  %v2523_v30 = vadd.f32 %v2188_v26, %v329_v25 }
 0x218   :  { %v2192_v29 = vpop.f32.mrb[6].mxu0  ;;  %v2524_v33 = vadd.f32 %v2190_v28, %v333_v27 }
 0x219   :  { %v2525_v31 = vadd.f32 %v2192_v29, %v329_v25  ;;  %v2194_v32 = vpop.f32.mrb[7].mxu0 }
 0x21a   :  { %v2526_v35 = vadd.f32 %v2194_v32, %v333_v27 }
 0x21b   :  { %v2201_v36 = vmul.f32 %v2525_v31, %v2523_v30 }
 0x21c   :  { %v2202_v37 = vmul.f32 %v2526_v35, %v2524_v33 }
 0x21d   :  { %v2206_v38 = vadd.f32 %v2205_v49, %v2201_v36 }
 0x21f   :  { %v2207_v39 = vadd.f32 %v2206_v38, %v2202_v37 }
 0x221   :  { %2208 = vadd.xlane.f32.xlu0 %v2207_v39 }
 0x2ae   :  { %v2209_v40 = vpop.xlane.xlu0 %2208 }
 0x2af   :  { %v2210_v41 = vmul.f32 0.1, %v2209_v40 }
 0x2b1   :  { %2212 = vst.msk [vmem:[%s3935_s3] sm:$0xff] %vm2211_vm0, %v2210_v41 }

</bundles_post_ra>
